<compile_context>
chip_gen: v7x
topology: tpu7x:2x2x1
jax: 0.10.0
libtpu: 0.0.40
codegen_flags: <defaults>
</compile_context>

<pallas_src>
import math

import jax
import jax.numpy as jnp
from jax.experimental import pallas as pl
from jax.experimental.pallas import tpu as pltpu

BN_EPS = 1e-5


def _round_up(v, m):
    return ((v + m - 1) // m) * m


def _largest_divisor_leq(n, cap):
    for c in range(min(cap, n), 0, -1):
        if n % c == 0:
            return c
    return 1


# ---------------------------------------------------------------------------
# Kernel 1: fused unfold (VMEM im2col) + Linear + ReLU -> bf16 activations and
#           per-block partial BN sums (sum, sum-of-squares).
# ---------------------------------------------------------------------------
def _make_fwd_kernel(ctx, dilation, D, new_t_pad, bb, k_pad, masked):
    rows = bb * new_t_pad
    kd = ctx * D

    def kernel(*refs):
        if masked:
            x_ref, w_ref, b_ref, m_ref, y_ref, st_ref, lhs_ref = refs
        else:
            x_ref, w_ref, b_ref, y_ref, st_ref, lhs_ref = refs

        # VMEM-only im2col: per (batch-in-tile, tap) static slab stores into
        # the (rows, k_pad) LHS scratch.  No HBM expansion, no value reshapes.
        for lb in range(bb):
            r0 = lb * new_t_pad
            for c in range(ctx):
                s0 = c * dilation
                lhs_ref[r0:r0 + new_t_pad, c * D:(c + 1) * D] = (
                    x_ref[lb, s0:s0 + new_t_pad, :].astype(jnp.bfloat16))
        if kd < k_pad:
            # Zero the K padding (its weights are already zero, but
            # uninitialized VMEM could hold NaN and 0 * NaN = NaN).
            lhs_ref[:, kd:] = jnp.zeros((rows, k_pad - kd), jnp.bfloat16)

        # One MXU matmul per grid step: M = bb*new_t_pad, K = k_pad (128-mult).
        acc = jnp.dot(lhs_ref[...], w_ref[...],
                      preferred_element_type=jnp.float32)
        y = jnp.maximum(acc + b_ref[...], 0.0)          # bias + ReLU, f32
        y_ref[...] = y.astype(y_ref.dtype)              # bf16 writeback

        # Per-block partial BN stats (padded time rows zeroed by the mask).
        yv = y * m_ref[...] if masked else y
        st_ref[0, 0:1, :] = jnp.sum(yv, axis=0, keepdims=True)
        st_ref[0, 1:2, :] = jnp.sum(yv * yv, axis=0, keepdims=True)

    return kernel


# ---------------------------------------------------------------------------
# Kernel 2: y * scale + shift (BN affine normalize), lane-dense, parallel.
# ---------------------------------------------------------------------------
def _make_bn_kernel(new_t):
    def kernel(y_ref, ss_ref, o_ref):
        scale = ss_ref[0:1, :]
        shift = ss_ref[1:2, :]
        o_ref[0] = y_ref[:new_t, :].astype(jnp.float32) * scale + shift

    return kernel


# ---------------------------------------------------------------------------
# Wrapper
# ---------------------------------------------------------------------------
def tdnn_forward(x, params, *, context_size, dilation=1, batch_norm=True,
                 eps=BN_EPS):
    """x: (B, T, D) f32 -> (B, T - dilation*(context_size-1), output_dim)."""
    w_taps, bias, gamma, beta = params            # w_taps: (ctx, D, cout)
    B, T, D = x.shape
    ctx = context_size
    cout = w_taps.shape[-1]

    new_t = T - dilation * (ctx - 1)
    assert new_t > 0, "sequence too short for context window"
    new_t_pad = _round_up(new_t, 8)               # sublane alignment
    coutp = _round_up(cout, 128)                  # lane-dense output channels
    kd = ctx * D
    k_pad = _round_up(kd, 128)                    # MXU-aligned contraction dim
    t_need = dilation * (ctx - 1) + new_t_pad

    # Batch tile: prefer a divisor of B (avoids padded batch elements), then
    # shrink if the per-step VMEM blocks would get too large.
    bb = _largest_divisor_leq(B, 8)

    def _vmem_bytes(bb_):
        rows_ = bb_ * new_t_pad
        return (2 * bb_ * max(T, t_need) * D * 4       # x blocks (2x buffered)
                + 2 * rows_ * coutp * 2                # y blocks (2x buffered)
                + rows_ * k_pad * 2                    # lhs scratch
                + 2 * k_pad * coutp * 2)               # weights

    while bb > 1 and _vmem_bytes(bb) > 24 * 1024 * 1024:
        bb -= 1
    # TODO(synk): add an explicit time-tile grid axis (with a context halo) so a
    # single (bb, T, D) block cannot exceed v7x's 64 MiB VMEM for very long T.

    b_pad = _round_up(B, bb)
    rows = bb * new_t_pad
    nb = b_pad // bb

    need_pad = (t_need > T) or (b_pad > B)
    if need_pad:
        x_in = jnp.pad(x.astype(jnp.bfloat16),
                       ((0, b_pad - B), (0, max(t_need - T, 0)), (0, 0)))
    else:
        x_in = x          # keep f32, cast to bf16 in-kernel (no prologue copy)
    t_x = x_in.shape[1]

    # Fused tap weights: row index c*D + d matches F.unfold's channel ordering.
    w2 = jnp.zeros((k_pad, coutp), jnp.bfloat16)
    w2 = w2.at[:kd, :cout].set(w_taps.reshape(kd, cout).astype(jnp.bfloat16))
    b2 = jnp.zeros((1, coutp), jnp.float32).at[:, :cout].set(
        bias.reshape(1, cout).astype(jnp.float32))

    masked = new_t_pad != new_t
    inputs = [x_in, w2, b2]
    in_specs = [
        pl.BlockSpec((bb, t_x, D), lambda i: (i, 0, 0)),        # activations
        pl.BlockSpec((k_pad, coutp), lambda i: (0, 0)),         # fused weights
        pl.BlockSpec((1, coutp), lambda i: (0, 0)),             # bias
    ]
    if masked:
        tmask = (jnp.arange(new_t_pad) < new_t).astype(jnp.float32)
        inputs.append(jnp.tile(tmask, (bb,)).reshape(rows, 1))
        in_specs.append(pl.BlockSpec((rows, 1), lambda i: (0, 0)))

    kernel = _make_fwd_kernel(ctx, dilation, D, new_t_pad, bb, k_pad, masked)

    y2d, stats_part = pl.pallas_call(
        kernel,
        out_shape=(
            jax.ShapeDtypeStruct((b_pad * new_t_pad, coutp), jnp.bfloat16),
            jax.ShapeDtypeStruct((nb, 2, coutp), jnp.float32),
        ),
        grid=(nb,),
        in_specs=in_specs,
        out_specs=(
            pl.BlockSpec((rows, coutp), lambda i: (i, 0)),
            pl.BlockSpec((1, 2, coutp), lambda i: (i, 0, 0)),
        ),
        scratch_shapes=[pltpu.VMEM((rows, k_pad), jnp.bfloat16)],
        compiler_params=pltpu.CompilerParams(
            dimension_semantics=("parallel",),    # both TCs on v7x
            vmem_limit_bytes=32 * 1024 * 1024,
        ),
    )(*inputs)

    if not batch_norm:
        y3 = y2d.reshape(b_pad, new_t_pad, coutp)[:B, :new_t, :cout]
        return y3.astype(jnp.float32)

    # Tiny JAX epilogue: reduce per-block partial sums, correct for padded
    # batch elements (their rows are exactly relu(bias)), finalize scale/shift.
    sum_c = jnp.sum(stats_part[:, 0, :], axis=0)
    ssq_c = jnp.sum(stats_part[:, 1, :], axis=0)
    if b_pad > B:
        rb = jnp.maximum(b2[0], 0.0)
        n_pad_rows = float((b_pad - B) * new_t)
        sum_c = sum_c - n_pad_rows * rb
        ssq_c = ssq_c - n_pad_rows * rb * rb
    m_total = float(B * new_t)
    mean = sum_c / m_total
    var = jnp.maximum(ssq_c / m_total - mean * mean, 0.0)   # biased, clamped
    g2 = jnp.zeros((coutp,), jnp.float32).at[:cout].set(gamma.astype(jnp.float32))
    bt2 = jnp.zeros((coutp,), jnp.float32).at[:cout].set(beta.astype(jnp.float32))
    scale = g2 * jax.lax.rsqrt(var + eps)
    shift = bt2 - mean * scale
    ss = jnp.stack([scale, shift], axis=0)                  # (2, coutp) f32

    out = pl.pallas_call(
        _make_bn_kernel(new_t),
        out_shape=jax.ShapeDtypeStruct((B, new_t, coutp), jnp.float32),
        grid=(B,),
        in_specs=[
            pl.BlockSpec((new_t_pad, coutp), lambda b: (b, 0)),
            pl.BlockSpec((2, coutp), lambda b: (0, 0)),
        ],
        out_specs=pl.BlockSpec((1, new_t, coutp), lambda b: (b, 0, 0)),
        compiler_params=pltpu.CompilerParams(
            dimension_semantics=("parallel",),
            vmem_limit_bytes=32 * 1024 * 1024,
        ),
    )(y2d, ss)

    return out if coutp == cout else out[:, :, :cout]


# ---------------------------------------------------------------------------
# Synthetic parameters (mirrors PyTorch layout: Linear weight (out, ctx*D) with
# unfold ordering tap-major / feature-minor, split into per-tap (D, out) slabs).
# ---------------------------------------------------------------------------
def make_tdnn_params(key, input_dim, output_dim, context_size):
    k1, k2, k3, k4 = jax.random.split(key, 4)
    fan_in = input_dim * context_size
    w_linear = jax.random.normal(k1, (output_dim, fan_in), jnp.float32) * (
        1.0 / math.sqrt(fan_in))
    bias = 0.1 * jax.random.normal(k2, (output_dim,), jnp.float32)
    gamma = 1.0 + 0.1 * jax.random.normal(k3, (output_dim,), jnp.float32)
    beta = 0.1 * jax.random.normal(k4, (output_dim,), jnp.float32)
    # (out, ctx*D) -> (ctx, D, out)
    w_taps = jnp.transpose(
        w_linear.reshape(output_dim, context_size, input_dim), (1, 2, 0))
    return (w_taps, bias, gamma, beta)


# ---------------------------------------------------------------------------
# Pure-JAX reference (f32 everywhere) for a sanity check.
# ---------------------------------------------------------------------------
def tdnn_reference(x, params, *, context_size, dilation=1, eps=BN_EPS):
    w_taps, bias, gamma, beta = params
    B, T, D = x.shape
    new_t = T - dilation * (context_size - 1)
    y = jnp.broadcast_to(bias, (B, new_t, bias.shape[0])).astype(jnp.float32)
    for c in range(context_size):
        xs = x[:, c * dilation:c * dilation + new_t, :]
        y = y + jnp.einsum("btd,do->bto", xs, w_taps[c])
    y = jnp.maximum(y, 0.0)
    mean = jnp.mean(y, axis=(0, 1))
    var = jnp.mean((y - mean) ** 2, axis=(0, 1))            # biased (train)
    return (y - mean) * jax.lax.rsqrt(var + eps) * gamma + beta


if __name__ == "__main__":
    key = jax.random.PRNGKey(0)

    def run_case(B, T, D, out_dim, ctx, dil, k):
        kx, kp = jax.random.split(k)
        x = jax.random.normal(kx, (B, T, D), jnp.float32)
        params = make_tdnn_params(kp, D, out_dim, ctx)
        out = tdnn_forward(x, params, context_size=ctx, dilation=dil,
                           batch_norm=True)
        out = jax.block_until_ready(out)
        new_t = T - dil * (ctx - 1)
        assert out.shape == (B, new_t, out_dim), out.shape
        assert bool(jnp.all(jnp.isfinite(out)))
        # Loose tolerance: kernel uses bf16 MXU inputs / bf16 intermediate y
        # with f32 accumulation and f32 BN math.
        ref = tdnn_reference(x, params, context_size=ctx, dilation=dil)
        err = float(jnp.max(jnp.abs(out - ref)))
        assert err < 1e-1, err

    k1, k2 = jax.random.split(key)
    # Case 1: new_t (=14) not a multiple of 8 -> padded x + masked-stats path.
    run_case(B=2, T=16, D=32, out_dim=64, ctx=3, dil=1, k=k1)
    # Case 2: new_t (=16) a multiple of 8 -> no-pad path (f32 x, in-kernel cast).
    run_case(B=2, T=18, D=32, out_dim=64, ctx=3, dil=1, k=k2)

    print("KERNEL_OK")
</pallas_src>

<mosaic_0001>
module attributes {stable_mosaic.version = 11 : i64} {
  func.func @kernel(%arg0: i32, %arg1: memref<2x18x32xbf16, #tpu.memory_space<vmem>>, %arg2: memref<128x128xbf16, #tpu.memory_space<vmem>>, %arg3: memref<1x128xf32, #tpu.memory_space<vmem>>, %arg4: memref<32x1xf32, #tpu.memory_space<vmem>>, %arg5: memref<32x128xbf16, #tpu.memory_space<vmem>>, %arg6: memref<1x2x128xf32, #tpu.memory_space<vmem>>, %arg7: memref<32x128xbf16, #tpu.memory_space<vmem>>) attributes {dimension_semantics = [#tpu.dimension_semantics<parallel>], iteration_bounds = array<i64: 1>, scalar_prefetch = 0 : i64, scratch_operands = 1 : i64, tpu.core_type = #tpu.core_type<tc>, window_params = [{transform_indices = @transform_0, window_bounds = array<i64: 2, 18, 32>}, {pipeline_mode = #tpu.pipeline_mode<synchronous>, transform_indices = @transform_1, window_bounds = array<i64: 128, 128>}, {pipeline_mode = #tpu.pipeline_mode<synchronous>, transform_indices = @transform_2, window_bounds = array<i64: 1, 128>}, {pipeline_mode = #tpu.pipeline_mode<synchronous>, transform_indices = @transform_3, window_bounds = array<i64: 32, 1>}, {transform_indices = @transform_4, window_bounds = array<i64: 32, 128>}, {transform_indices = @transform_5, window_bounds = array<i64: 1, 2, 128>}]} {
    %c0 = arith.constant 0 : index
    %c0_0 = arith.constant 0 : index
    %c0_1 = arith.constant 0 : index
    %0 = vector.load %arg1[%c0, %c0_0, %c0_1] : memref<2x18x32xbf16, #tpu.memory_space<vmem>>, vector<1x16x32xbf16>
    %1 = vector.shape_cast %0 : vector<1x16x32xbf16> to vector<16x32xbf16>
    %c0_2 = arith.constant 0 : index
    %c0_3 = arith.constant 0 : index
    %2 = vector.load %arg7[%c0_2, %c0_3] : memref<32x128xbf16, #tpu.memory_space<vmem>>, vector<16x32xbf16>
    tpu.vector_store %arg7[%c0_2, %c0_3], %1 {strides = array<i32>} : memref<32x128xbf16, #tpu.memory_space<vmem>>, vector<16x32xbf16>,
    %c0_4 = arith.constant 0 : index
    %c1 = arith.constant 1 : index
    %c0_5 = arith.constant 0 : index
    %3 = vector.load %arg1[%c0_4, %c1, %c0_5] : memref<2x18x32xbf16, #tpu.memory_space<vmem>>, vector<1x16x32xbf16>
    %4 = vector.shape_cast %3 : vector<1x16x32xbf16> to vector<16x32xbf16>
    %c0_6 = arith.constant 0 : index
    %c32 = arith.constant 32 : index
    %5 = vector.load %arg7[%c0_6, %c32] : memref<32x128xbf16, #tpu.memory_space<vmem>>, vector<16x32xbf16>
    tpu.vector_store %arg7[%c0_6, %c32], %4 {strides = array<i32>} : memref<32x128xbf16, #tpu.memory_space<vmem>>, vector<16x32xbf16>,
    %c0_7 = arith.constant 0 : index
    %c2 = arith.constant 2 : index
    %c0_8 = arith.constant 0 : index
    %6 = vector.load %arg1[%c0_7, %c2, %c0_8] : memref<2x18x32xbf16, #tpu.memory_space<vmem>>, vector<1x16x32xbf16>
    %7 = vector.shape_cast %6 : vector<1x16x32xbf16> to vector<16x32xbf16>
    %c0_9 = arith.constant 0 : index
    %c64 = arith.constant 64 : index
    %8 = vector.load %arg7[%c0_9, %c64] : memref<32x128xbf16, #tpu.memory_space<vmem>>, vector<16x32xbf16>
    tpu.vector_store %arg7[%c0_9, %c64], %7 {strides = array<i32>} : memref<32x128xbf16, #tpu.memory_space<vmem>>, vector<16x32xbf16>,
    %c1_10 = arith.constant 1 : index
    %c0_11 = arith.constant 0 : index
    %c0_12 = arith.constant 0 : index
    %9 = vector.load %arg1[%c1_10, %c0_11, %c0_12] : memref<2x18x32xbf16, #tpu.memory_space<vmem>>, vector<1x16x32xbf16>
    %10 = vector.shape_cast %9 : vector<1x16x32xbf16> to vector<16x32xbf16>
    %c16 = arith.constant 16 : index
    %c0_13 = arith.constant 0 : index
    %11 = vector.load %arg7[%c16, %c0_13] : memref<32x128xbf16, #tpu.memory_space<vmem>>, vector<16x32xbf16>
    tpu.vector_store %arg7[%c16, %c0_13], %10 {strides = array<i32>} : memref<32x128xbf16, #tpu.memory_space<vmem>>, vector<16x32xbf16>,
    %c1_14 = arith.constant 1 : index
    %c1_15 = arith.constant 1 : index
    %c0_16 = arith.constant 0 : index
    %12 = vector.load %arg1[%c1_14, %c1_15, %c0_16] : memref<2x18x32xbf16, #tpu.memory_space<vmem>>, vector<1x16x32xbf16>
    %13 = vector.shape_cast %12 : vector<1x16x32xbf16> to vector<16x32xbf16>
    %c16_17 = arith.constant 16 : index
    %c32_18 = arith.constant 32 : index
    %14 = vector.load %arg7[%c16_17, %c32_18] : memref<32x128xbf16, #tpu.memory_space<vmem>>, vector<16x32xbf16>
    tpu.vector_store %arg7[%c16_17, %c32_18], %13 {strides = array<i32>} : memref<32x128xbf16, #tpu.memory_space<vmem>>, vector<16x32xbf16>,
    %c1_19 = arith.constant 1 : index
    %c2_20 = arith.constant 2 : index
    %c0_21 = arith.constant 0 : index
    %15 = vector.load %arg1[%c1_19, %c2_20, %c0_21] : memref<2x18x32xbf16, #tpu.memory_space<vmem>>, vector<1x16x32xbf16>
    %16 = vector.shape_cast %15 : vector<1x16x32xbf16> to vector<16x32xbf16>
    %c16_22 = arith.constant 16 : index
    %c64_23 = arith.constant 64 : index
    %17 = vector.load %arg7[%c16_22, %c64_23] : memref<32x128xbf16, #tpu.memory_space<vmem>>, vector<16x32xbf16>
    tpu.vector_store %arg7[%c16_22, %c64_23], %16 {strides = array<i32>} : memref<32x128xbf16, #tpu.memory_space<vmem>>, vector<16x32xbf16>,
    %cst = arith.constant 0.000000e+00 : bf16
    %18 = vector.broadcast %cst : bf16 to vector<32x32xbf16>
    %c0_24 = arith.constant 0 : index
    %c96 = arith.constant 96 : index
    %19 = vector.load %arg7[%c0_24, %c96] : memref<32x128xbf16, #tpu.memory_space<vmem>>, vector<32x32xbf16>
    tpu.vector_store %arg7[%c0_24, %c96], %18 {strides = array<i32>} : memref<32x128xbf16, #tpu.memory_space<vmem>>, vector<32x32xbf16>,
    %c0_25 = arith.constant 0 : index
    %c0_26 = arith.constant 0 : index
    %20 = vector.load %arg7[%c0_25, %c0_26] : memref<32x128xbf16, #tpu.memory_space<vmem>>, vector<32x128xbf16>
    %c0_27 = arith.constant 0 : index
    %c0_28 = arith.constant 0 : index
    %21 = vector.load %arg2[%c0_27, %c0_28] : memref<128x128xbf16, #tpu.memory_space<vmem>>, vector<128x128xbf16>
    %cst_29 = arith.constant dense<0.000000e+00> : vector<32x128xf32>
    %22 = tpu.matmul %20, %21, %cst_29 {dimension_numbers = #tpu.dot_dimension_numbers<[1], [0], [0], [1], [0, 0, 1, 1], [], []>} : vector<32x128xbf16>, vector<128x128xbf16>, vector<32x128xf32> -> vector<32x128xf32>
    %c0_30 = arith.constant 0 : index
    %c0_31 = arith.constant 0 : index
    %23 = vector.load %arg3[%c0_30, %c0_31] : memref<1x128xf32, #tpu.memory_space<vmem>>, vector<1x128xf32>
    %24 = vector.broadcast %23 : vector<1x128xf32> to vector<32x128xf32>
    %25 = arith.addf %22, %24 : vector<32x128xf32>
    %cst_32 = arith.constant 0.000000e+00 : f32
    %26 = vector.broadcast %cst_32 : f32 to vector<32x128xf32>
    %27 = arith.maximumf %25, %26 : vector<32x128xf32>
    %28 = arith.truncf %27 : vector<32x128xf32> to vector<32x128xbf16>
    %c0_33 = arith.constant 0 : index
    %c0_34 = arith.constant 0 : index
    %29 = vector.load %arg5[%c0_33, %c0_34] : memref<32x128xbf16, #tpu.memory_space<vmem>>, vector<32x128xbf16>
    tpu.vector_store %arg5[%c0_33, %c0_34], %28 {strides = array<i32>} : memref<32x128xbf16, #tpu.memory_space<vmem>>, vector<32x128xbf16>,
    %c0_35 = arith.constant 0 : index
    %c0_36 = arith.constant 0 : index
    %30 = vector.load %arg4[%c0_35, %c0_36] : memref<32x1xf32, #tpu.memory_space<vmem>>, vector<32x1xf32>
    %31 = vector.broadcast %30 : vector<32x1xf32> to vector<32x128xf32>
    %32 = arith.mulf %27, %31 : vector<32x128xf32>
    %cst_37 = arith.constant dense<0.000000e+00> : vector<128xf32>
    %33 = vector.multi_reduction <add>, %32, %cst_37 [0] : vector<32x128xf32> to vector<128xf32>
    %34 = vector.shape_cast %33 : vector<128xf32> to vector<1x128xf32>
    %c0_38 = arith.constant 0 : index
    %c0_39 = arith.constant 0 : index
    %c0_40 = arith.constant 0 : index
    %35 = vector.load %arg6[%c0_38, %c0_39, %c0_40] : memref<1x2x128xf32, #tpu.memory_space<vmem>>, vector<1x1x128xf32>
    %36 = vector.shape_cast %35 : vector<1x1x128xf32> to vector<1x128xf32>
    %37 = vector.shape_cast %34 : vector<1x128xf32> to vector<1x1x128xf32>
    tpu.vector_store %arg6[%c0_38, %c0_39, %c0_40], %37 {strides = array<i32>} : memref<1x2x128xf32, #tpu.memory_space<vmem>>, vector<1x1x128xf32>,
    %38 = arith.mulf %32, %32 : vector<32x128xf32>
    %cst_41 = arith.constant dense<0.000000e+00> : vector<128xf32>
    %39 = vector.multi_reduction <add>, %38, %cst_41 [0] : vector<32x128xf32> to vector<128xf32>
    %40 = vector.shape_cast %39 : vector<128xf32> to vector<1x128xf32>
    %c0_42 = arith.constant 0 : index
    %c1_43 = arith.constant 1 : index
    %c0_44 = arith.constant 0 : index
    %41 = vector.load %arg6[%c0_42, %c1_43, %c0_44] : memref<1x2x128xf32, #tpu.memory_space<vmem>>, vector<1x1x128xf32>
    %42 = vector.shape_cast %41 : vector<1x1x128xf32> to vector<1x128xf32>
    %43 = vector.shape_cast %40 : vector<1x128xf32> to vector<1x1x128xf32>
    tpu.vector_store %arg6[%c0_42, %c1_43, %c0_44], %43 {strides = array<i32>} : memref<1x2x128xf32, #tpu.memory_space<vmem>>, vector<1x1x128xf32>,
    return
  }
  func.func @transform_0(%arg0: i32) -> (i32, i32, i32) {
    %c0_i32 = arith.constant 0 : i32
    %c0_i32_0 = arith.constant 0 : i32
    %c0_i32_1 = arith.constant 0 : i32
    return %arg0, %c0_i32, %c0_i32_0 : i32, i32, i32
  }
  func.func @transform_1(%arg0: i32) -> (i32, i32) {
    %c0_i32 = arith.constant 0 : i32
    %c0_i32_0 = arith.constant 0 : i32
    %c0_i32_1 = arith.constant 0 : i32
    return %c0_i32, %c0_i32_0 : i32, i32
  }
  func.func @transform_2(%arg0: i32) -> (i32, i32) {
    %c0_i32 = arith.constant 0 : i32
    %c0_i32_0 = arith.constant 0 : i32
    %c0_i32_1 = arith.constant 0 : i32
    return %c0_i32, %c0_i32_0 : i32, i32
  }
  func.func @transform_3(%arg0: i32) -> (i32, i32) {
    %c0_i32 = arith.constant 0 : i32
    %c0_i32_0 = arith.constant 0 : i32
    %c0_i32_1 = arith.constant 0 : i32
    return %c0_i32, %c0_i32_0 : i32, i32
  }
  func.func @transform_4(%arg0: i32) -> (i32, i32) {
    %c0_i32 = arith.constant 0 : i32
    %c0_i32_0 = arith.constant 0 : i32
    return %arg0, %c0_i32 : i32, i32
  }
  func.func @transform_5(%arg0: i32) -> (i32, i32, i32) {
    %c0_i32 = arith.constant 0 : i32
    %c0_i32_0 = arith.constant 0 : i32
    %c0_i32_1 = arith.constant 0 : i32
    return %arg0, %c0_i32, %c0_i32_0 : i32, i32, i32
  }
}

</mosaic_0001>

<bundles_post_ra>
// kernel: tpu_custom_call.1
= control target key start
LH: loop header
LB: loop body
LE: loop exit
PB: predicated region body
PF: predicated region fallthrough
CT: control target
= control target key end

     0   :  { %11 = vsyncpa [#allocation4], 0  ;;  %vm43_vm0 = vsmask.f32 7424  ;;  %vm72_vm1 = vcmask 1046528   ;;  %s517_s11 = smov 32   ;;  %s654_s0 = inlined_call_operand.vmem [shape: bf16[2,18,32], index: 0, kind: input, shape index: {}]   ;;  %s655_s1 = inlined_call_operand.vmem [shape: bf16[128,128], index: 1, kind: input, shape index: {}]   ;;  %s656_s2 = inlined_call_operand.vmem [shape: f32[1,128], index: 2, kind: input, shape index: {}]   ;;  %s657_s3 = inlined_call_operand.vmem [shape: f32[32,1], index: 3, kind: input, shape index: {}]   ;;  %s658_s4 = inlined_call_operand.hbm [shape: bf16[32,128], index: 4, kind: output, shape index: {0}]   ;;  %s659_s5 = inlined_call_operand.hbm [shape: f32[1,2,128], index: 5, kind: output, shape index: {1}]  }
   0x1   :  { %v451_v0 = vld [vmem:[%s654_s0] sm:$0xff]   ;;  %v452_v1 = vld [vmem:[%s654_s0 + $0x8] ss:$0 sps:$4 sm:$0x11]   ;;  %v453_v2 = vld [vmem:[%s654_s0 + $0xc] sm:$0xff]   ;;  %s518_s16 = smov 64  }
   0x2   :  { %v45_v3 = vshrl.u32 %v451_v0, 16  ;;  %v47_v4 = vshll.u32 %v451_v0, 16  ;;  %v52_v5 = vshll.u32 %v452_v1, 16  ;;  %v454_v6 = vld [vmem:[%s654_s0 + $0x14] ss:$0 sps:$4 sm:$0x11]  }
   0x3   :  { %v103_v7 = vshrl.u32 %v453_v2, 16  ;;  %v105_v8 = vshll.u32 %v453_v2, 16  ;;  %v110_v12 = vshll.u32 %v454_v6, 16  ;;  %v455_v13 = vld [vmem:[%s654_s0] sm:$0xfe]   ;;  %v460_v28 = vld [vmem:[%s655_s1 + $0x8] sm:$0xff]  }
   0x4   :  { %v49_v9 = vrot.slane %v47_v4, 1  ;;  %v54_v10 = vrot.slane %v52_v5, 1  ;;  %v456_v15 = vld [vmem:[%s654_s0 + $0x8] ss:$0 sps:$4 sm:$0x11]   ;;  %v459_v16 = vld [vmem:[%s655_s1] sm:$0xff]  }
   0x5   :  { %v107_v11 = vrot.slane %v105_v8, 1  ;;  %v112_v18 = vrot.slane %v110_v12, 1  ;;  %v73_v19 = vrot.slane %v455_v13, 1  ;;  %v74_v21 = vrot.slane %v456_v15, 1  ;;  %v457_v22 = vld [vmem:[%s654_s0 + $0xc] sm:$0xfe]   ;;  %423 = vmatprep.subr.bf16.mxu0 %v459_v16 }
   0x6   :  { %v50_v14 = vor.u32 %v49_v9, %v45_v3  ;;  %v458_v23 = vld [vmem:[%s654_s0 + $0x14] ss:$0 sps:$4 sm:$0x11]   ;;  %424 = vmatpush3.bf16.msra.mxu0 %v459_v16  ;;  %v129_v26 = vrot.slane %v457_v22, 1  ;;  %v462_v31 = vld [vmem:[%s655_s1 + $0x18] sm:$0xff]   ;;  %vm30_vm2 = vcmask 261120  }
   0x7   :  { %v108_v17 = vor.u32 %v107_v11, %v103_v7  ;;  %v75_v25 = vsel %vm72_vm1, %v73_v19, %v74_v21  ;;  %v130_v27 = vrot.slane %v458_v23, 1  ;;  %v461_v29 = vld [vmem:[%s655_s1 + $0x10] sm:$0xff]   ;;  %425 = vmatprep.subr.bf16.mxu0 %v460_v28  ;;  %v464_v32 = vld [vmem:[%s654_s0] sm:$0xff]   ;;  %v519_v34 = vmov 0   ;;  %v286_v36 = vld [vmem:[%s657_s3 + $0x8] sm:$0xff] }
   0x8   :  { %v55_v20 = vsel %vm43_vm0, %v50_v14, %v54_v10  ;;  %v465_v33 = vld [vmem:[%s654_s0 + $0xc] sm:$0xff]   ;;  %31 = vst.msk [vmem:[#allocation2] sm:$0xff] %vm30_vm2, %v464_v32  ;;  %450 = vset.pattern.permute.xlu1 %v519_v34  ;;  %v463_v35 = vld [vmem:[%s655_s1 + $0x20] sm:$0xff]   ;;  %449 = vset.pattern.permute.xlu0 %v519_v34 }
   0x9   :  { %56 = vrot.lane.b32.xlu0 %v55_v20, %s517_s11  ;;  %v113_v24 = vsel %vm43_vm0, %v108_v17, %v112_v18  ;;  %v131_v30 = vsel %vm72_vm1, %v129_v26, %v130_v27  ;;  %90 = vst.msk [vmem:[#allocation2 + $0x8] sm:$0xff] %vm30_vm2, %v465_v33  ;;  %v285_v37 = vld [vmem:[%s657_s3] sm:$0xff]  ;;  %v287_v38 = vld [vmem:[%s657_s3 + $0x10] sm:$0xff] }
   0xa   :  { %114 = vrot.lane.b32.xlu1 %v113_v24, %s517_s11  ;;  %426 = vmatpush3.bf16.msra.mxu0 %v460_v28 }
   0xb   :  { %427 = vmatprep.subr.bf16.mxu0 %v461_v29 }
   0xd   :  { %76 = vrot.lane.b32.xlu0 %v75_v25, %s518_s16 }
   0xe   :  { %132 = vrot.lane.b32.xlu1 %v131_v30, %s518_s16  ;;  %428 = vmatpush3.bf16.msra.mxu0 %v461_v29 }
   0xf   :  { %429 = vmatprep.subr.bf16.mxu0 %v462_v31 }
  0x11   :  { %291 = vperm.xlu0 %449, %v285_v37  }
  0x12   :  { %296 = vperm.xlu1 %450, %v286_v36  }
  0x13   :  { %12 = vsyncpa [#allocation6], 0  ;;  %430 = vmatpush3.bf16.msra.mxu0 %v462_v31  ;;  %v288_v39 = vld [vmem:[%s657_s3 + $0x18] sm:$0xff]  ;;  %v466_v40 = vld [vmem:[%s655_s1 + $0x28] sm:$0xff]   ;;  %vm59_vm3 = vcmask 523520   ;;  %vm79_vm4 = vcmask 785920  }
  0x14   :  { %431 = vmatprep.subr.bf16.mxu0 %v463_v35  ;;  %v467_v41 = vld [vmem:[%s655_s1 + $0x30] sm:$0xff]   ;;  %v468_v42 = vld [vmem:[%s655_s1 + $0x38] sm:$0xff]   ;;  %vm136_vm5 = vcmask 1048320   ;;  %v385_v49 = vld [vmem:[%s656_s2] ss:$0 sm:$0xff]  ;;  %s520_s13 = smov [#allocation3]  }
  0x15   :  { %306 = vperm.xlu0 %449, %v288_v39   ;;  %s342_s14 = sshll.u32 %s520_s13, 4  ;;  %s343_s14 = int_to_ptr.vmem [resolvable:$true] %s342_s14 }
  0x16   :  { %301 = vperm.xlu1 %450, %v287_v38   ;;  %s469_s2 = scalar_lea.vmem %s343_s14, 256  ;;  %p474_p1 = scmp.lt.s32.totalorder %s343_s14, %s343_s14 }
  0x17   :  { %432 = vmatpush3.bf16.msra.mxu0 %v463_v35  ;;  %p470_p0 = scmp.ne.s32.totalorder %s343_s14, %s469_s2  ;;  %p475_p2 = scmp.lt.s32.totalorder %s469_s2, %s469_s2 }
  0x18   :  { %433 = vmatprep.subr.bf16.mxu0 %v466_v40 }
  0x19   :  { %p476_p3 = por %p475_p2, %p474_p1 }
  0x1b   :  { %434 = vmatpush3.bf16.msra.mxu0 %v466_v40  ;;  %p477_p4 = pnand %p476_p3, %p470_p0 }
  0x1c   :  { %435 = vmatprep.subr.bf16.mxu0 %v467_v41 }
  0x1f   :  { %436 = vmatpush3.bf16.msra.mxu0 %v467_v41 }
  0x20   :  { %437 = vmatprep.subr.bf16.mxu0 %v468_v42 }
  0x23   :  { %438 = vmatpush3.bf16.msra.mxu0 %v468_v42 }
  0x7b   :  { %v57_v43 = vpop.permute.xlu0 %56 }
  0x7c   :  { %60 = vst.msk [vmem:[#allocation2] sm:$0xff] %vm59_vm3, %v57_v43  ;;  %v115_v44 = vpop.permute.xlu1 %114 }
  0x7d   :  { %117 = vst.msk [vmem:[#allocation2 + $0x8] sm:$0xff] %vm59_vm3, %v115_v44 }
  0x7f   :  { %v77_v45 = vpop.permute.xlu0 %76 }
  0x80   :  { %80 = vst.msk [vmem:[#allocation2] sm:$0xff] %vm79_vm4, %v77_v45  ;;  %v133_v46 = vpop.permute.xlu1 %132 }
  0x81   :  { %137 = vst.msk [vmem:[#allocation2] sm:$0xff] %vm136_vm5, %v519_v34 }
  0x82   :  { %135 = vst.msk [vmem:[#allocation2 + $0x8] sm:$0xff] %vm79_vm4, %v133_v46 }
  0x83   :  { %138 = vst.msk [vmem:[#allocation2 + $0x8] sm:$0xff] %vm136_vm5, %v519_v34 }
  0x88   :  { %v139_v47 = vld [vmem:[#allocation2] sm:$0xff] }
  0x89   :  { %439 = vmatprep.mubr.bf16.mxu0 %v139_v47 }
  0x8a   :  { %v140_v48 = vld [vmem:[#allocation2 + $0x8] sm:$0xff] }
  0x8b   :  { %440 = vmatmul.mubr.bf16.vlgmr.msra.gmra.mrb[0].mxu0 %v140_v48 }
  0x90   :  { %v292_v54 = vpop.permute.xlu0 %291 }
  0x91   :  { %v297_v50 = vpop.permute.xlu1 %296 }
  0x94   :  { %v307_v3 = vpop.permute.xlu0 %306 }
  0x95   :  { %v302_v63 = vpop.permute.xlu1 %301 }
 0x15e   :  { %v441_v51 = vpop.f32.mrb[0].mxu0 }
 0x15f   :  { %v255_v52 = vadd.f32 %v441_v51, %v385_v49  ;;  %v246_v53 = vpop.f32.mrb[1].mxu0 }
 0x160   :  { %v247_v55 = vadd.f32 %v385_v49, %v246_v53  ;;  %v442_v56 = vpop.f32.mrb[2].mxu0 }
 0x161   :  { %v258_v57 = vadd.f32 %v442_v56, %v385_v49  ;;  %v249_v58 = vpop.f32.mrb[3].mxu0  ;;  %v263_v59 = vmax.f32 %v255_v52, 0.0 }
 0x162   :  { %v261_v60 = vmax.f32 %v247_v55, 0.0  ;;  %v250_v61 = vadd.f32 %v385_v49, %v249_v58 }
 0x163   :  { %v264_v62 = vmax.f32 %v258_v57, 0.0  ;;  %v311_v6 = vmul.f32 %v302_v63, %v263_v59 }
 0x164   :  { %v309_v0 = vmul.f32 %v292_v54, %v261_v60  ;;  %v262_v1 = vmax.f32 %v250_v61, 0.0 }
 0x165   :  { %v410_v2 = vpack.c.bf16 %v264_v62, %v263_v59  ;;  %v312_v10 = vmul.f32 %v307_v3, %v264_v62 }
 0x166   :  { %v405_v4 = vpack.c.bf16 %v262_v1, %v261_v60  ;;  %v310_v5 = vmul.f32 %v297_v50, %v262_v1  ;;  %v323_v7 = vmul.f32 %v309_v0, %v309_v0 }
 0x167   :  { %412 = vst [vmem:[#allocation3 + $0x8] sm:$0xff] %v410_v2  }
 0x168   :  { %406 = vst [vmem:[#allocation3] sm:$0xff] %v405_v4   ;;  %v324_v8 = vmul.f32 %v310_v5, %v310_v5  ;;  %v313_v9 = vadd.f32 %v310_v5, %v309_v0 }
 0x169   :  { %480 = shalt.err (!%p477_p4)
}
 0x16a   :  { %s481_s18 = scalar_lea.hbm %s658_s4, 256 }
 0x16b   :  { %p482_p5 = scmp.ne.s32.totalorder %s658_s4, %s481_s18  ;;  %p485_p6 = scmp.lt.u32.totalorder %s481_s18, %s658_s4 }
 0x16d   :  { %p487_p7 = pnand %p485_p6, %p482_p5 }
 0x16f   :  { %490 = shalt.err (!%p487_p7)
}
 0x170   :  { %s521_s23 = smov 4   ;;  %v314_v11 = vadd.f32 %v313_v9, %v311_v6  ;;  %v325_v12 = vmul.f32 %v311_v6, %v311_v6  ;;  %v327_v13 = vadd.f32 %v324_v8, %v323_v7  ;;  %v326_v16 = vmul.f32 %v312_v10, %v312_v10  ;;  %s522_s26 = smov [#allocation5]  }
 0x171   :  { %348 = dma.vmem_to_hbm [thread:$0]  %s343_s14, 256, %s658_s4, [#allocation4], %s518_s16, %s518_s16, %s521_s23  }
 0x172   :  { %v328_v14 = vadd.f32 %v327_v13, %v325_v12  ;;  %v315_v15 = vadd.f32 %v314_v11, %v312_v10  ;;  %s355_s27 = sshll.u32 %s522_s26, 4  ;;  %s356_s27 = int_to_ptr.vmem [resolvable:$true] %s355_s27 }
 0x173   :  { %s491_s4 = scalar_lea.vmem %s356_s27, 32  ;;  %p496_p9 = scmp.lt.s32.totalorder %s356_s27, %s356_s27 }
 0x174   :  { %v316_v17 = vrot.slane %v315_v15, 4  ;;  %v329_v18 = vadd.f32 %v328_v14, %v326_v16  ;;  %p492_p8 = scmp.ne.s32.totalorder %s356_s27, %s491_s4  ;;  %p497_p10 = scmp.lt.s32.totalorder %s491_s4, %s491_s4 }
 0x176   :  { %v317_v19 = vadd.f32 %v316_v17, %v315_v15  ;;  %v330_v20 = vrot.slane %v329_v18, 4  ;;  %p498_p11 = por %p497_p10, %p496_p9 }
 0x178   :  { %v318_v21 = vrot.slane %v317_v19, 2  ;;  %v331_v22 = vadd.f32 %v330_v20, %v329_v18  ;;  %p499_p12 = pnand %p498_p11, %p492_p8 }
 0x17a   :  { %v319_v23 = vadd.f32 %v318_v21, %v317_v19  ;;  %v332_v24 = vrot.slane %v331_v22, 2 }
 0x17c   :  { %v320_v25 = vrot.slane %v319_v23, 1  ;;  %v333_v26 = vadd.f32 %v332_v24, %v331_v22 }
 0x17e   :  { %v321_v27 = vadd.f32 %v320_v25, %v319_v23  ;;  %v334_v28 = vrot.slane %v333_v26, 1 }
 0x180   :  { %322 = vst [vmem:[#allocation5] sm:$0x1] %v321_v27  ;;  %v335_v29 = vadd.f32 %v334_v28, %v333_v26 }
 0x182   :  { %336 = vst [vmem:[#allocation5 + $0x1] sm:$0x1] %v335_v29 }
 0x183   :  { %502 = shalt.err (!%p499_p12)
}
 0x184   :  { %s503_s0 = scalar_lea.hbm %s659_s5, 32 }
 0x185   :  { %p504_p13 = scmp.ne.s32.totalorder %s659_s5, %s503_s0  ;;  %p507_p0 = scmp.lt.u32.totalorder %s503_s0, %s659_s5 }
 0x187   :  { %p509_p1 = pnand %p507_p0, %p504_p13 }
 0x189   :  { %512 = shalt.err (!%p509_p1)
}
 0x18a   :  { %358 = dma.vmem_to_hbm [thread:$0]  %s356_s27, 32, %s659_s5, [#allocation6]  }
 0x18b   :  { %513 = dma.done.wait [#allocation4], 256  }
 0x18c   :  { %514 = vsyncadd [#allocation4], 4294967040 }
 0x18d   :  { %515 = dma.done.wait [#allocation6], 32  }
 0x18e   :  { %516 = vsyncadd [#allocation6], 4294967264 }
 0x18f   :  { %365 = vsyncpa [#allocation4], 1 }
 0x190   :  { %366 = vsyncpa [#allocation6], 1 }

</bundles_post_ra>
